<compile_context>
chip_gen: v5e
topology: v5e:2x2
jax: 0.10.0
libtpu: 0.0.40
codegen_flags: <defaults>
</compile_context>

<pallas_src>
import functools

import jax
import jax.numpy as jnp
import numpy as np
from jax.experimental import pallas as pl
from jax.experimental.pallas import tpu as pltpu


# ----------------------------------------------------------------------------
# Pallas kernel: one batch element per grid step, activations laid out (C, HW).
# ----------------------------------------------------------------------------
def _spatial_cgnl_kernel(x_ref, y_ref, wt_ref, wpg_ref, wz_ref,
                         gsum_p_ref, gstat_in_ref, bcast_in_ref,
                         gamma_ref, beta_ref, o_ref, *, planes, eps):
    f32 = jnp.float32
    x = x_ref[0]                                      # (Cin, HW)  bf16
    y = y_ref[0]                                      # (Cin, HW)  bf16
    hw = x.shape[1]

    # --- 1x1 convs on the MXU: bf16 operands, f32 accumulation ---------------
    t = jnp.dot(wt_ref[...], x, preferred_element_type=f32)         # (Cp,  HW)
    pg = jnp.dot(wpg_ref[...], y, preferred_element_type=f32)       # (2Cp, HW)
    p, g = pg[:planes], pg[planes:]

    # Grouped z-conv: wz is block-diagonal and the attention scalar is constant
    # per group, so Wz @ (t * att) == (Wz @ t) * att.  Issue the matmul on t so
    # it overlaps the attention reduction below.
    zt = jnp.dot(wz_ref[...], t.astype(jnp.bfloat16),
                 preferred_element_type=f32)                         # (Cin, HW)

    # --- per-(batch, group) dot-product attention scalar (f32) ---------------
    ones_hw = jnp.ones((hw, 1), f32)
    rowsum = jnp.dot(p * g, ones_hw, preferred_element_type=f32)     # (Cp, 1)
    att_g = jnp.dot(gsum_p_ref[...], rowsum,
                    preferred_element_type=f32)                      # (G, 1)  use_scale folded
    att_c = jnp.dot(bcast_in_ref[...], att_g,
                    preferred_element_type=f32)                      # (Cin, 1)
    z = zt * att_c                                                   # (Cin, HW) f32

    # --- GroupNorm: per-group mean/var over (channels-of-group, HW), f32 -----
    s1 = jnp.dot(z, ones_hw, preferred_element_type=f32)             # (Cin, 1)
    s2 = jnp.dot(z * z, ones_hw, preferred_element_type=f32)         # (Cin, 1)
    mean_g = jnp.dot(gstat_in_ref[...], s1, preferred_element_type=f32)   # (G, 1)  1/n folded
    ex2_g = jnp.dot(gstat_in_ref[...], s2, preferred_element_type=f32)    # (G, 1)
    inv_g = jax.lax.rsqrt(ex2_g - mean_g * mean_g + eps)
    mean_c = jnp.dot(bcast_in_ref[...], mean_g, preferred_element_type=f32)  # (Cin, 1)
    inv_c = jnp.dot(bcast_in_ref[...], inv_g, preferred_element_type=f32)    # (Cin, 1)

    out = (z - mean_c) * inv_c * gamma_ref[...] + beta_ref[...] + x.astype(f32)
    o_ref[0] = out.astype(o_ref.dtype)


# ----------------------------------------------------------------------------
# One-time parameter packing (parameters, not activations -> do it once).
# ----------------------------------------------------------------------------
def prepare_cgnl_params(params, *, inplanes, planes, groups, hw, use_scale):
    f32, bf16 = jnp.float32, jnp.bfloat16
    G = groups
    cg_p, cg_in = planes // G, inplanes // G

    wt = params["wt"].astype(bf16)                                        # (Cp, Cin)
    wpg = jnp.concatenate([params["wp"], params["wg"]], 0).astype(bf16)   # (2Cp, Cin)

    # grouped conv z: PyTorch weight (Cin, Cp/G) -> block-diagonal (Cin, Cp).
    wz_pt = params["wz"].astype(f32)
    gid_in = jnp.arange(inplanes) // cg_in
    gid_p = jnp.arange(planes) // cg_p
    same = gid_in[:, None] == gid_p[None, :]
    col = jnp.clip(jnp.arange(planes)[None, :] - gid_in[:, None] * cg_p, 0, cg_p - 1)
    wz_bd = jnp.where(same, jnp.take_along_axis(wz_pt, col, axis=1),
                      0.0).astype(bf16)                                   # (Cin, Cp)
    # TODO(synk): when cg_p, cg_in >= 256 (128 on v5e), per-group matmuls beat
    # this block-diagonal form (it wastes (G-1)/G of the MXU flops).

    # Thin group-membership matrices with the scalar constants folded in.
    scale = 1.0 / float(cg_p * hw) ** 0.5 if use_scale else 1.0
    gids = jnp.arange(G)
    gsum_p = (gids[:, None] == gid_p[None, :]).astype(f32) * scale        # (G, Cp)
    gstat_in = ((gids[:, None] == gid_in[None, :]).astype(f32)
                / float(hw * cg_in))                                      # (G, Cin)
    bcast_in = (gid_in[:, None] == gids[None, :]).astype(f32)             # (Cin, G)

    gamma = params["gn_weight"].reshape(inplanes, 1).astype(f32)
    beta = params["gn_bias"].reshape(inplanes, 1).astype(f32)
    return dict(wt=wt, wpg=wpg, wz=wz_bd, gsum_p=gsum_p, gstat_in=gstat_in,
                bcast_in=bcast_in, gamma=gamma, beta=beta)


# ----------------------------------------------------------------------------
# Forward wrapper: reshape-only layout plumbing + pallas_call.
# ----------------------------------------------------------------------------
def spatial_cgnl_forward(x_nchw, y_nchw, packed, *, groups, eps=1e-5):
    del groups  # group structure is baked into the packed parameters
    B, Cin, H, W = x_nchw.shape
    Cp = packed["wt"].shape[0]
    HW = H * W

    # NCHW -> (B, Cin, HW): a pure reshape, no transpose / extra HBM pass.
    x = x_nchw.reshape(B, Cin, HW).astype(jnp.bfloat16)
    y = y_nchw.reshape(B, Cin, HW).astype(jnp.bfloat16)

    consts = [packed[k] for k in
              ("wt", "wpg", "wz", "gsum_p", "gstat_in", "bcast_in", "gamma", "beta")]

    kernel = functools.partial(_spatial_cgnl_kernel, planes=Cp, eps=eps)
    const_spec = lambda a: pl.BlockSpec(a.shape, lambda b: (0, 0))

    # Explicit VMEM budget: double-buffered bf16 activation slabs + weights.
    act_bytes = 2 * 3 * Cin * HW * 2
    wgt_bytes = 2 * sum(int(np.prod(a.shape)) * a.dtype.itemsize for a in consts)
    vmem_limit = int(max(16 << 20, min(2 * (act_bytes + wgt_bytes), 48 << 20)))

    out = pl.pallas_call(
        kernel,
        out_shape=jax.ShapeDtypeStruct((B, Cin, HW), jnp.bfloat16),
        grid_spec=pltpu.PrefetchScalarGridSpec(
            num_scalar_prefetch=0,
            grid=(B,),
            in_specs=[pl.BlockSpec((1, Cin, HW), lambda b: (b, 0, 0)),   # x
                      pl.BlockSpec((1, Cin, HW), lambda b: (b, 0, 0))]   # y
                     + [const_spec(a) for a in consts],
            out_specs=pl.BlockSpec((1, Cin, HW), lambda b: (b, 0, 0)),
        ),
        compiler_params=pltpu.CompilerParams(
            dimension_semantics=("parallel",),
            vmem_limit_bytes=vmem_limit),
    )(x, y, *consts)

    return out.reshape(B, Cin, H, W)


# ----------------------------------------------------------------------------
# Pure-JAX f32 reference (mirrors the PyTorch module, NCHW).
# ----------------------------------------------------------------------------
def spatial_cgnl_reference(x, y, params, *, groups, use_scale=False, eps=1e-5):
    hp = jax.lax.Precision.HIGHEST
    wt, wp, wg = params["wt"], params["wp"], params["wg"]
    t = jnp.einsum("oc,bchw->bohw", wt, x, precision=hp)
    p = jnp.einsum("oc,bchw->bohw", wp, y, precision=hp)
    g = jnp.einsum("oc,bchw->bohw", wg, y, precision=hp)
    b, c, h, w = t.shape
    cg = c // groups
    parts = []
    for gi in range(groups):
        ts = t[:, gi * cg:(gi + 1) * cg]
        ps = p[:, gi * cg:(gi + 1) * cg]
        gs = g[:, gi * cg:(gi + 1) * cg]
        att = jnp.sum(ps.reshape(b, -1) * gs.reshape(b, -1), axis=1)
        if use_scale:
            att = att / float(cg * h * w) ** 0.5
        parts.append(att[:, None, None, None] * ts)
    xk = jnp.concatenate(parts, axis=1)

    Cin = x.shape[1]
    cin_g, cp_g = Cin // groups, c // groups
    wz = params["wz"]
    zparts = []
    for gi in range(groups):
        w_blk = wz[gi * cin_g:(gi + 1) * cin_g, :]
        zparts.append(jnp.einsum("oi,bihw->bohw", w_blk,
                                 xk[:, gi * cp_g:(gi + 1) * cp_g], precision=hp))
    z = jnp.concatenate(zparts, axis=1)

    zr = z.reshape(b, groups, -1)
    mean = zr.mean(-1, keepdims=True)
    var = ((zr - mean) ** 2).mean(-1, keepdims=True)
    zn = ((zr - mean) / jnp.sqrt(var + eps)).reshape(b, Cin, h, w)
    return zn * params["gn_weight"][None, :, None, None] + \
        params["gn_bias"][None, :, None, None] + x


if __name__ == "__main__":
    B, INPLANES, PLANES, H, W = 2, 8, 8, 16, 16
    GROUPS = 2
    USE_SCALE = False

    key = jax.random.PRNGKey(0)
    kx, ky, k1, k2, k3, k4, k5, k6 = jax.random.split(key, 8)

    x = jax.random.normal(kx, (B, INPLANES, H, W), jnp.float32)
    y = jax.random.normal(ky, (B, INPLANES, H, W), jnp.float32)

    params = {
        "wt": jax.random.normal(k1, (PLANES, INPLANES), jnp.float32) * 0.05,
        "wp": jax.random.normal(k2, (PLANES, INPLANES), jnp.float32) * 0.05,
        "wg": jax.random.normal(k3, (PLANES, INPLANES), jnp.float32) * 0.05,
        # grouped conv z weight, PyTorch shape (inplanes, planes // groups)
        "wz": jax.random.normal(k4, (INPLANES, PLANES // GROUPS), jnp.float32) * 0.05,
        "gn_weight": 1.0 + 0.1 * jax.random.normal(k5, (INPLANES,), jnp.float32),
        "gn_bias": 0.1 * jax.random.normal(k6, (INPLANES,), jnp.float32),
    }

    packed = prepare_cgnl_params(params, inplanes=INPLANES, planes=PLANES,
                                 groups=GROUPS, hw=H * W, use_scale=USE_SCALE)

    out = spatial_cgnl_forward(x, y, packed, groups=GROUPS)
    out = jax.block_until_ready(out)

    # The kernel stores activations / conv weights in bf16 (f32 accumulation on
    # the MXU), so validate against the f32 reference evaluated on the same
    # bf16-rounded inputs & conv weights; this isolates kernel-math error from
    # the expected ~1e-3 relative bf16 storage quantization.
    rb = lambda a: a.astype(jnp.bfloat16).astype(jnp.float32)
    params_bf = dict(params, wt=rb(params["wt"]), wp=rb(params["wp"]),
                     wg=rb(params["wg"]), wz=rb(params["wz"]))
    ref = spatial_cgnl_reference(rb(x), rb(y), params_bf, groups=GROUPS,
                                 use_scale=USE_SCALE)
    np.testing.assert_allclose(np.asarray(out.astype(jnp.float32)),
                               np.asarray(ref), rtol=2e-2, atol=2e-2)
    print("KERNEL_OK")
</pallas_src>

<mosaic_0001>
module attributes {stable_mosaic.version = 11 : i64} {
  func.func @_spatial_cgnl_kernel(%arg0: i32, %arg1: memref<1x8x256xbf16, #tpu.memory_space<vmem>>, %arg2: memref<1x8x256xbf16, #tpu.memory_space<vmem>>, %arg3: memref<8x8xbf16, #tpu.memory_space<vmem>>, %arg4: memref<16x8xbf16, #tpu.memory_space<vmem>>, %arg5: memref<8x8xbf16, #tpu.memory_space<vmem>>, %arg6: memref<2x8xf32, #tpu.memory_space<vmem>>, %arg7: memref<2x8xf32, #tpu.memory_space<vmem>>, %arg8: memref<8x2xf32, #tpu.memory_space<vmem>>, %arg9: memref<8x1xf32, #tpu.memory_space<vmem>>, %arg10: memref<8x1xf32, #tpu.memory_space<vmem>>, %arg11: memref<1x8x256xbf16, #tpu.memory_space<vmem>>) attributes {dimension_semantics = [#tpu.dimension_semantics<parallel>], iteration_bounds = array<i64: 2>, scalar_prefetch = 0 : i64, scratch_operands = 0 : i64, tpu.core_type = #tpu.core_type<tc>, window_params = [{transform_indices = @transform_0, window_bounds = array<i64: 1, 8, 256>}, {transform_indices = @transform_1, window_bounds = array<i64: 1, 8, 256>}, {pipeline_mode = #tpu.pipeline_mode<synchronous>, transform_indices = @transform_2, window_bounds = array<i64: 8, 8>}, {pipeline_mode = #tpu.pipeline_mode<synchronous>, transform_indices = @transform_3, window_bounds = array<i64: 16, 8>}, {pipeline_mode = #tpu.pipeline_mode<synchronous>, transform_indices = @transform_4, window_bounds = array<i64: 8, 8>}, {pipeline_mode = #tpu.pipeline_mode<synchronous>, transform_indices = @transform_5, window_bounds = array<i64: 2, 8>}, {pipeline_mode = #tpu.pipeline_mode<synchronous>, transform_indices = @transform_6, window_bounds = array<i64: 2, 8>}, {pipeline_mode = #tpu.pipeline_mode<synchronous>, transform_indices = @transform_7, window_bounds = array<i64: 8, 2>}, {pipeline_mode = #tpu.pipeline_mode<synchronous>, transform_indices = @transform_8, window_bounds = array<i64: 8, 1>}, {pipeline_mode = #tpu.pipeline_mode<synchronous>, transform_indices = @transform_9, window_bounds = array<i64: 8, 1>}, {transform_indices = @transform_10, window_bounds = array<i64: 1, 8, 256>}]} {
    %c0 = arith.constant 0 : index
    %c0_0 = arith.constant 0 : index
    %c0_1 = arith.constant 0 : index
    %0 = vector.load %arg1[%c0, %c0_0, %c0_1] : memref<1x8x256xbf16, #tpu.memory_space<vmem>>, vector<1x8x256xbf16>
    %1 = vector.shape_cast %0 : vector<1x8x256xbf16> to vector<8x256xbf16>
    %c0_2 = arith.constant 0 : index
    %c0_3 = arith.constant 0 : index
    %c0_4 = arith.constant 0 : index
    %2 = vector.load %arg2[%c0_2, %c0_3, %c0_4] : memref<1x8x256xbf16, #tpu.memory_space<vmem>>, vector<1x8x256xbf16>
    %3 = vector.shape_cast %2 : vector<1x8x256xbf16> to vector<8x256xbf16>
    %c0_5 = arith.constant 0 : index
    %c0_6 = arith.constant 0 : index
    %4 = vector.load %arg3[%c0_5, %c0_6] : memref<8x8xbf16, #tpu.memory_space<vmem>>, vector<8x8xbf16>
    %cst = arith.constant dense<0.000000e+00> : vector<8x256xf32>
    %5 = tpu.matmul %4, %1, %cst {dimension_numbers = #tpu.dot_dimension_numbers<[1], [0], [0], [1], [0, 0, 1, 1], [], []>} : vector<8x8xbf16>, vector<8x256xbf16>, vector<8x256xf32> -> vector<8x256xf32>
    %c0_7 = arith.constant 0 : index
    %c0_8 = arith.constant 0 : index
    %6 = vector.load %arg4[%c0_7, %c0_8] : memref<16x8xbf16, #tpu.memory_space<vmem>>, vector<16x8xbf16>
    %cst_9 = arith.constant dense<0.000000e+00> : vector<16x256xf32>
    %7 = tpu.matmul %6, %3, %cst_9 {dimension_numbers = #tpu.dot_dimension_numbers<[1], [0], [0], [1], [0, 0, 1, 1], [], []>} : vector<16x8xbf16>, vector<8x256xbf16>, vector<16x256xf32> -> vector<16x256xf32>
    %8 = vector.extract_strided_slice %7 {offsets = [0, 0], sizes = [8, 256], strides = [1, 1]} : vector<16x256xf32> to vector<8x256xf32>
    %9 = vector.extract_strided_slice %7 {offsets = [8, 0], sizes = [8, 256], strides = [1, 1]} : vector<16x256xf32> to vector<8x256xf32>
    %c0_10 = arith.constant 0 : index
    %c0_11 = arith.constant 0 : index
    %10 = vector.load %arg5[%c0_10, %c0_11] : memref<8x8xbf16, #tpu.memory_space<vmem>>, vector<8x8xbf16>
    %11 = arith.truncf %5 : vector<8x256xf32> to vector<8x256xbf16>
    %cst_12 = arith.constant dense<0.000000e+00> : vector<8x256xf32>
    %12 = tpu.matmul %10, %11, %cst_12 {dimension_numbers = #tpu.dot_dimension_numbers<[1], [0], [0], [1], [0, 0, 1, 1], [], []>} : vector<8x8xbf16>, vector<8x256xbf16>, vector<8x256xf32> -> vector<8x256xf32>
    %cst_13 = arith.constant 1.000000e+00 : f32
    %13 = vector.broadcast %cst_13 : f32 to vector<256x1xf32>
    %14 = arith.mulf %8, %9 : vector<8x256xf32>
    %cst_14 = arith.constant dense<0.000000e+00> : vector<8x1xf32>
    %15 = tpu.matmul %14, %13, %cst_14 {dimension_numbers = #tpu.dot_dimension_numbers<[1], [0], [0], [1], [0, 0, 1, 1], [], []>} : vector<8x256xf32>, vector<256x1xf32>, vector<8x1xf32> -> vector<8x1xf32>
    %c0_15 = arith.constant 0 : index
    %c0_16 = arith.constant 0 : index
    %16 = vector.load %arg6[%c0_15, %c0_16] : memref<2x8xf32, #tpu.memory_space<vmem>>, vector<2x8xf32>
    %cst_17 = arith.constant dense<0.000000e+00> : vector<2x1xf32>
    %17 = tpu.matmul %16, %15, %cst_17 {dimension_numbers = #tpu.dot_dimension_numbers<[1], [0], [0], [1], [0, 0, 1, 1], [], []>} : vector<2x8xf32>, vector<8x1xf32>, vector<2x1xf32> -> vector<2x1xf32>
    %c0_18 = arith.constant 0 : index
    %c0_19 = arith.constant 0 : index
    %18 = vector.load %arg8[%c0_18, %c0_19] : memref<8x2xf32, #tpu.memory_space<vmem>>, vector<8x2xf32>
    %cst_20 = arith.constant dense<0.000000e+00> : vector<8x1xf32>
    %19 = tpu.matmul %18, %17, %cst_20 {dimension_numbers = #tpu.dot_dimension_numbers<[1], [0], [0], [1], [0, 0, 1, 1], [], []>} : vector<8x2xf32>, vector<2x1xf32>, vector<8x1xf32> -> vector<8x1xf32>
    %20 = vector.broadcast %19 : vector<8x1xf32> to vector<8x256xf32>
    %21 = arith.mulf %12, %20 : vector<8x256xf32>
    %cst_21 = arith.constant dense<0.000000e+00> : vector<8x1xf32>
    %22 = tpu.matmul %21, %13, %cst_21 {dimension_numbers = #tpu.dot_dimension_numbers<[1], [0], [0], [1], [0, 0, 1, 1], [], []>} : vector<8x256xf32>, vector<256x1xf32>, vector<8x1xf32> -> vector<8x1xf32>
    %23 = arith.mulf %21, %21 : vector<8x256xf32>
    %cst_22 = arith.constant dense<0.000000e+00> : vector<8x1xf32>
    %24 = tpu.matmul %23, %13, %cst_22 {dimension_numbers = #tpu.dot_dimension_numbers<[1], [0], [0], [1], [0, 0, 1, 1], [], []>} : vector<8x256xf32>, vector<256x1xf32>, vector<8x1xf32> -> vector<8x1xf32>
    %c0_23 = arith.constant 0 : index
    %c0_24 = arith.constant 0 : index
    %25 = vector.load %arg7[%c0_23, %c0_24] : memref<2x8xf32, #tpu.memory_space<vmem>>, vector<2x8xf32>
    %cst_25 = arith.constant dense<0.000000e+00> : vector<2x1xf32>
    %26 = tpu.matmul %25, %22, %cst_25 {dimension_numbers = #tpu.dot_dimension_numbers<[1], [0], [0], [1], [0, 0, 1, 1], [], []>} : vector<2x8xf32>, vector<8x1xf32>, vector<2x1xf32> -> vector<2x1xf32>
    %c0_26 = arith.constant 0 : index
    %c0_27 = arith.constant 0 : index
    %27 = vector.load %arg7[%c0_26, %c0_27] : memref<2x8xf32, #tpu.memory_space<vmem>>, vector<2x8xf32>
    %cst_28 = arith.constant dense<0.000000e+00> : vector<2x1xf32>
    %28 = tpu.matmul %27, %24, %cst_28 {dimension_numbers = #tpu.dot_dimension_numbers<[1], [0], [0], [1], [0, 0, 1, 1], [], []>} : vector<2x8xf32>, vector<8x1xf32>, vector<2x1xf32> -> vector<2x1xf32>
    %29 = arith.mulf %26, %26 : vector<2x1xf32>
    %30 = arith.subf %28, %29 : vector<2x1xf32>
    %cst_29 = arith.constant 9.99999974E-6 : f32
    %31 = vector.broadcast %cst_29 : f32 to vector<2x1xf32>
    %32 = arith.addf %30, %31 : vector<2x1xf32>
    %33 = math.rsqrt %32 : vector<2x1xf32>
    %c0_30 = arith.constant 0 : index
    %c0_31 = arith.constant 0 : index
    %34 = vector.load %arg8[%c0_30, %c0_31] : memref<8x2xf32, #tpu.memory_space<vmem>>, vector<8x2xf32>
    %cst_32 = arith.constant dense<0.000000e+00> : vector<8x1xf32>
    %35 = tpu.matmul %34, %26, %cst_32 {dimension_numbers = #tpu.dot_dimension_numbers<[1], [0], [0], [1], [0, 0, 1, 1], [], []>} : vector<8x2xf32>, vector<2x1xf32>, vector<8x1xf32> -> vector<8x1xf32>
    %c0_33 = arith.constant 0 : index
    %c0_34 = arith.constant 0 : index
    %36 = vector.load %arg8[%c0_33, %c0_34] : memref<8x2xf32, #tpu.memory_space<vmem>>, vector<8x2xf32>
    %cst_35 = arith.constant dense<0.000000e+00> : vector<8x1xf32>
    %37 = tpu.matmul %36, %33, %cst_35 {dimension_numbers = #tpu.dot_dimension_numbers<[1], [0], [0], [1], [0, 0, 1, 1], [], []>} : vector<8x2xf32>, vector<2x1xf32>, vector<8x1xf32> -> vector<8x1xf32>
    %38 = vector.broadcast %35 : vector<8x1xf32> to vector<8x256xf32>
    %39 = arith.subf %21, %38 : vector<8x256xf32>
    %40 = vector.broadcast %37 : vector<8x1xf32> to vector<8x256xf32>
    %41 = arith.mulf %39, %40 : vector<8x256xf32>
    %c0_36 = arith.constant 0 : index
    %c0_37 = arith.constant 0 : index
    %42 = vector.load %arg9[%c0_36, %c0_37] : memref<8x1xf32, #tpu.memory_space<vmem>>, vector<8x1xf32>
    %43 = vector.broadcast %42 : vector<8x1xf32> to vector<8x256xf32>
    %44 = arith.mulf %41, %43 : vector<8x256xf32>
    %c0_38 = arith.constant 0 : index
    %c0_39 = arith.constant 0 : index
    %45 = vector.load %arg10[%c0_38, %c0_39] : memref<8x1xf32, #tpu.memory_space<vmem>>, vector<8x1xf32>
    %46 = vector.broadcast %45 : vector<8x1xf32> to vector<8x256xf32>
    %47 = arith.addf %44, %46 : vector<8x256xf32>
    %48 = arith.extf %1 : vector<8x256xbf16> to vector<8x256xf32>
    %49 = arith.addf %47, %48 : vector<8x256xf32>
    %50 = arith.truncf %49 : vector<8x256xf32> to vector<8x256xbf16>
    %c0_40 = arith.constant 0 : index
    %c0_41 = arith.constant 0 : index
    %c0_42 = arith.constant 0 : index
    %51 = vector.load %arg11[%c0_40, %c0_41, %c0_42] : memref<1x8x256xbf16, #tpu.memory_space<vmem>>, vector<1x8x256xbf16>
    %52 = vector.shape_cast %51 : vector<1x8x256xbf16> to vector<8x256xbf16>
    %53 = vector.shape_cast %50 : vector<8x256xbf16> to vector<1x8x256xbf16>
    tpu.vector_store %arg11[%c0_40, %c0_41, %c0_42], %53 {strides = array<i32>} : memref<1x8x256xbf16, #tpu.memory_space<vmem>>, vector<1x8x256xbf16>,
    return
  }
  func.func @transform_0(%arg0: i32) -> (i32, i32, i32) {
    %c0_i32 = arith.constant 0 : i32
    %c0_i32_0 = arith.constant 0 : i32
    %c0_i32_1 = arith.constant 0 : i32
    return %arg0, %c0_i32, %c0_i32_0 : i32, i32, i32
  }
  func.func @transform_1(%arg0: i32) -> (i32, i32, i32) {
    %c0_i32 = arith.constant 0 : i32
    %c0_i32_0 = arith.constant 0 : i32
    %c0_i32_1 = arith.constant 0 : i32
    return %arg0, %c0_i32, %c0_i32_0 : i32, i32, i32
  }
  func.func @transform_2(%arg0: i32) -> (i32, i32) {
    %c0_i32 = arith.constant 0 : i32
    %c0_i32_0 = arith.constant 0 : i32
    %c0_i32_1 = arith.constant 0 : i32
    return %c0_i32, %c0_i32_0 : i32, i32
  }
  func.func @transform_3(%arg0: i32) -> (i32, i32) {
    %c0_i32 = arith.constant 0 : i32
    %c0_i32_0 = arith.constant 0 : i32
    %c0_i32_1 = arith.constant 0 : i32
    return %c0_i32, %c0_i32_0 : i32, i32
  }
  func.func @transform_4(%arg0: i32) -> (i32, i32) {
    %c0_i32 = arith.constant 0 : i32
    %c0_i32_0 = arith.constant 0 : i32
    %c0_i32_1 = arith.constant 0 : i32
    return %c0_i32, %c0_i32_0 : i32, i32
  }
  func.func @transform_5(%arg0: i32) -> (i32, i32) {
    %c0_i32 = arith.constant 0 : i32
    %c0_i32_0 = arith.constant 0 : i32
    %c0_i32_1 = arith.constant 0 : i32
    return %c0_i32, %c0_i32_0 : i32, i32
  }
  func.func @transform_6(%arg0: i32) -> (i32, i32) {
    %c0_i32 = arith.constant 0 : i32
    %c0_i32_0 = arith.constant 0 : i32
    %c0_i32_1 = arith.constant 0 : i32
    return %c0_i32, %c0_i32_0 : i32, i32
  }
  func.func @transform_7(%arg0: i32) -> (i32, i32) {
    %c0_i32 = arith.constant 0 : i32
    %c0_i32_0 = arith.constant 0 : i32
    %c0_i32_1 = arith.constant 0 : i32
    return %c0_i32, %c0_i32_0 : i32, i32
  }
  func.func @transform_8(%arg0: i32) -> (i32, i32) {
    %c0_i32 = arith.constant 0 : i32
    %c0_i32_0 = arith.constant 0 : i32
    %c0_i32_1 = arith.constant 0 : i32
    return %c0_i32, %c0_i32_0 : i32, i32
  }
  func.func @transform_9(%arg0: i32) -> (i32, i32) {
    %c0_i32 = arith.constant 0 : i32
    %c0_i32_0 = arith.constant 0 : i32
    %c0_i32_1 = arith.constant 0 : i32
    return %c0_i32, %c0_i32_0 : i32, i32
  }
  func.func @transform_10(%arg0: i32) -> (i32, i32, i32) {
    %c0_i32 = arith.constant 0 : i32
    %c0_i32_0 = arith.constant 0 : i32
    %c0_i32_1 = arith.constant 0 : i32
    return %arg0, %c0_i32, %c0_i32_0 : i32, i32, i32
  }
}

</mosaic_0001>

<bundles_post_ra>
// kernel: tpu_custom_call.1
= control target key start
LH: loop header
LB: loop body
LE: loop exit
PB: predicated region body
PF: predicated region fallthrough
CT: control target
= control target key end

     0   :  { %15 = vsyncpa [#allocation3], 0  ;;  %s1487_s0 = inlined_call_operand.vmem [shape: bf16[2,8,256], index: 0, kind: input, shape index: {}]   ;;  %s1488_s1 = inlined_call_operand.hbm [shape: bf16[2,8,256], index: 1, kind: input, shape index: {}]   ;;  %s1489_s2 = inlined_call_operand.vmem [shape: bf16[8,8], index: 2, kind: input, shape index: {}]   ;;  %s1490_s3 = inlined_call_operand.vmem [shape: bf16[16,8], index: 3, kind: input, shape index: {}]   ;;  %s1491_s4 = inlined_call_operand.vmem [shape: bf16[8,8], index: 4, kind: input, shape index: {}]   ;;  %s1492_s5 = inlined_call_operand.vmem [shape: f32[2,8], index: 5, kind: input, shape index: {}]   ;;  %s1493_s6 = inlined_call_operand.vmem [shape: f32[2,8], index: 6, kind: input, shape index: {}]   ;;  %s1494_s7 = inlined_call_operand.vmem [shape: f32[8,2], index: 7, kind: input, shape index: {}]   ;;  %s1495_s8 = inlined_call_operand.vmem [shape: f32[8,1], index: 8, kind: input, shape index: {}]   ;;  %s1496_s9 = inlined_call_operand.vmem [shape: f32[8,1], index: 9, kind: input, shape index: {}]   ;;  %s1497_s10 = inlined_call_operand.hbm [shape: bf16[2,8,256], index: 10, kind: output, shape index: {}]  }
   0x1   :  { %17 = vsyncpa [#allocation3 + $0x1], 0 }
   0x2   :  { %18 = vsyncpa [#allocation4], 0 }
   0x3   :  { %20 = vsyncpa [#allocation4 + $0x1], 0  ;;  %s1200_s13 = smov 0   ;;  %s1202_s14 = smov 0  }
   0x4   :  { %s1204_s15 = smov 0   ;;  %s1206_s16 = smov 0  }
   0x5 LB: > { %1502 = sst [smem:[#allocation8_spill]] %s1137_s15  ;;  %s1221_s17 = sadd.s32 4294967295, %s1141_s16   ;;  %s1141_s16 = sphi %s1206_s16, %s1513_s16   ;;  %s1137_s15 = sphi %s1204_s15, %s1515_s15   ;;  %s1133_s14 = sphi %s1202_s14, %s1517_s14   ;;  %s1129_s13 = sphi %s1200_s13, %s1516_s13  }
   0x6   : > { %s953_s18 = sadd.s32 4294967294, %s1141_s16   ;;  %s1225_s19 = sadd.s32 1, %s1141_s16  }
   0x7   : > { %1503 = sst [smem:[#allocation9_spill]] %s1225_s19  ;;  %s59_s20 = sadd.s32 1, %s1137_s15 }
   0x8   : > { %s56_s21 = ssub.s32 %s1141_s16, %s1225_s19  ;;  %p66_p0 = scmp.ne.s32.totalorder %s1137_s15, %s1133_s14 }
   0x9   : > { %p57_p1 = scmp.eq.s32.totalorder %s56_s21, 0  ;;  %p67_p2 = scmp.eq.s32.totalorder %s1141_s16, 0 }
   0xa   : > { %p72_p3 = scmp.ne.s32.totalorder %s1133_s14, %s1129_s13  ;;  %p73_p4 = scmp.eq.s32.totalorder %s1221_s17, 0 }
   0xb   : > { %s1237_s22 = scalar_select %p57_p1, %s1137_s15, %s59_s20  }
   0xc   : > { %p1239_p5 = por %p67_p2, %p66_p0  ;;  %p1243_p6 = por %p73_p4, %p72_p3 }
   0xd   : > { %1504 = sst [smem:[#allocation10_spill]] %s1237_s22  ;;  %p264_p7 = scmp.eq.s32.totalorder %s1221_s17, 1 }
   0xe   : > { %p270_p8 = scmp.eq.s32.totalorder %s953_s18, 1  ;;  %p1004_p10 = scmp.lt.s32.totalorder %s1141_s16, 2 }
   0xf   : > { %p1250_p11 = por %p264_p7, %p66_p0  ;;  %s322_s27 = sand.u32 1, %s1137_s15  }
  0x10   : > { %p1254_p12 = por %p270_p8, %p72_p3  ;;  %s988_s28 = sshll.u32 %s1141_s16, 3 }
  0x11   : > { %s956_s29 = sshll.u32 %s322_s27, 3  ;;  %s331_s12 = scalar_lea.hbm %s1488_s1, %s988_s28 }
  0x12   : > { %s1508_s26 = scalar_select %p1254_p12, 1, 0 }
  0x13   : > { %s333_s20 = sshll.u32 %s331_s12, 4  ;;  %s326_s18 = scalar_lea.vmem [#allocation2], %s956_s29  ;;  %s334_s20 = int_to_ptr.hbm [resolvable:$true] %s333_s20 }
  0x14   : > { %1509 = sst [smem:[#allocation11_spill]] %s1508_s26  ;;  %s335_s21 = sshll.u32 %s326_s18, 4  ;;  %s336_s21 = int_to_ptr.vmem [resolvable:$true] %s335_s21 }
  0x15   : > { %p1265_p13 = pnand %p1004_p10, %p1239_p5  ;;  %p959_p0 = scmp.ge.s32.totalorder %s1141_s16, 1 }
  0x16   : > { %p340_p1 = scmp.lt.s32.totalorder %s1141_s16, 3  ;;  %s323_s15 = scalar_lea.sflag [#allocation3], %s322_s27 }
  0x17   : > { %s1045_s19 = sshra.s32 %s334_s20, 4  ;;  %p1049_p3 = pneg %p1265_p13  ;;  %s1046_s19 = int_to_ptr.hbm [resolvable:$true] %s1045_s19 }
  0x18   : > { %s1047_s26 = scalar_lea.hbm %s1046_s19, 8  ;;  %s1052_s23 = scalar_lea.hbm %s1488_s1, 16 }
  0x19   : > { %p1048_p2 = scmp.ne.s32.totalorder %s1046_s19, %s1047_s26  ;;  %p1053_p5 = scmp.lt.s32.totalorder %s1046_s19, %s1488_s1 }
  0x1a   : > { %p1054_p8 = scmp.lt.s32.totalorder %s1052_s23, %s1047_s26 }
  0x1b   : > { %p1050_p4 = pnand %p1049_p3, %p1048_p2 }
  0x1c   : > { %p1055_p10 = por %p1054_p8, %p1053_p5 }
  0x1d   : > { %p1051_p7 = pneg %p1050_p4 }
  0x1f   : > { %p1056_p9 = pnand %p1055_p10, %p1051_p7 }
  0x21   : > { %1059 = shalt.err (!%p1056_p9)
}
  0x22   : > { %999 = dma.hbm_to_vmem [thread:$0]  (!%p1265_p13), %s334_s20, 128, %s336_s21, %s323_s15  }
  0x23   : > { %p341_p2 = pnand %p959_p0, %p340_p1 }
  0x24   : > { %s1286_s27 = sand.u32 (!%p341_p2), 1, %s1133_s14  }
  0x25   : > { %344 = sbr.rel (%p341_p2) target bundleno = 1252 (0x4e4), region = 60  ;;  %s960_s19 = sshll.u32 (!%p341_p2), %s1286_s27, 3 }
  0x26   : > { %s347_s26 = scalar_lea.sflag (!%p341_p2), [#allocation3], %s1286_s27  ;;  %s350_s12 = scalar_lea.vmem (!%p341_p2), [#allocation2], %s960_s19 }
  0x2a   : > { %1120 = dma.done.wait (%p1243_p6), %s347_s26, 128  }
  0x2b   : > { %1122 = vsyncadd (%p1243_p6), %s347_s26, 4294967168  ;;  %p393_p9 = scmp.lt.s32.totalorder %s1221_s17, 1  ;;  %v400_v0 = vld [vmem:[%s350_s12] sm:$0xff]  ;;  %vm411_vm0 = vcmask 1043456   ;;  %vm407_vm1 = vcmask 64512   ;;  %v1143_v12 = vmov 1.0  }
  0x2c   : > { %v452_v2 = vunpack.c.l.b16 %v400_v0  ;;  %v453_v3 = vunpack.c.h.b16 %v400_v0  ;;  %v990_v10 = vld [vmem:[%s1490_s3] sm:$0xff]  ;;  %v1144_v38 = vmov 0   ;;  %vm602_vm2 = vcmask 1041408   ;;  %s991_s23 = sshll.u32 %s1221_s17, 3 }
  0x2d   : > { %s394_s15 = scalar_select %p393_p9, %s1221_s17, 1  ;;  %v1315_v13 = vld [vmem:[%s1489_s2] sm:$0xf]  ;;  %1040 = vset.pattern.permute.xlu0 %v1144_v38  ;;  %1041 = vset.pattern.permute.xlu1 %v1144_v38  ;;  %vm598_vm3 = vcmask 15360  }
  0x2e   : > { %v454_v5 = vpack.c.b16 %v452_v2, %v452_v2  ;;  %v455_v6 = vpack.c.b16 %v453_v3, %v453_v3  ;;  %v493_v22 = vld [vmem:[%s1491_s4] sm:$0xf]  ;;  %1042 = vset.pattern.permute.xlu2 %v1144_v38  ;;  %s866_s26 = scalar_lea.hbm %s1497_s10, %s991_s23  ;;  %s392_s17 = scalar_lea.vmem [#allocation5], %s960_s19 }
  0x2f   : > { %s989_s22 = sshll.u32 %s394_s15, 3  ;;  %v573_v37 = vld [vmem:[%s1492_s5] sm:$0x3]  ;;  %s868_s12 = sshll.u32 %s392_s17, 4  ;;  %s869_s12 = int_to_ptr.vmem [resolvable:$true] %s868_s12 }
  0x30   : > { %s397_s21 = scalar_lea.vmem %s1487_s0, %s989_s22  ;;  %v460_v8 = vsel %vm411_vm0, %v454_v5, 0  ;;  %v463_v9 = vsel %vm411_vm0, %v455_v6, 0  ;;  %v597_v41 = vld [vmem:[%s1494_s7] sm:$0xff]  ;;  %s870_s15 = sshll.u32 %s866_s26, 4  ;;  %s871_s15 = int_to_ptr.hbm [resolvable:$true] %s870_s15 }
  0x31   : > { %v1301_v1 = vld [vmem:[%s397_s21] sm:$0xff]  ;;  %472 = vmatpush.bf16.msra.mxu2 %v460_v8  ;;  %486 = vmatpush.bf16.msra.mxu3 %v463_v9  ;;  %s855_s22 = scalar_lea.sflag [#allocation4], %s1286_s27  ;;  %s1089_s20 = sshra.s32 %s871_s15, 4  ;;  %s1090_s20 = int_to_ptr.hbm [resolvable:$true] %s1089_s20 }
  0x32   : > { %v403_v4 = vunpack.c.l.b16 %v1301_v1  ;;  %v404_v14 = vunpack.c.h.b16 %v1301_v1  ;;  %v715_v52 = vld [vmem:[%s1493_s6] sm:$0x3]  ;;  %s1091_s18 = scalar_lea.hbm %s1090_s20, 8  ;;  %s1095_s19 = scalar_lea.hbm %s1497_s10, 16 }
  0x33   : > { %v840_v6 = vld [vmem:[%s1496_s9] sm:$0xff]  ;;  %p1092_p6 = scmp.ne.s32.totalorder %s1090_s20, %s1091_s18  ;;  %p1096_p1 = scmp.lt.s32.totalorder %s1090_s20, %s1497_s10 }
  0x34   : > { %v405_v7 = vpack.c.b16 %v403_v4, %v403_v4  ;;  %970 = vmatmul.msk.bf16.vlgmr.msra.gmra.mxu2 %vm407_vm1, %v990_v10  ;;  %971 = vmatmul.msk.bf16.vlgmr.msra.gmra.mxu3 %vm407_vm1, %v990_v10  ;;  %v406_v15 = vpack.c.b16 %v404_v14, %v404_v14  ;;  %v832_v8 = vld [vmem:[%s1495_s8] sm:$0xff]  ;;  %p1097_p3 = scmp.lt.s32.totalorder %s1095_s19, %s1091_s18 }
  0x35   : > { %533 = vmatpush.msrb.mxu2 %v1143_v12  ;;  %553 = vmatpush.msrb.mxu3 %v1143_v12  ;;  %p1093_p13 = pnand %p1092_p6, %p1250_p11 }
  0x36   : > { %v413_v11 = vsel %vm411_vm0, %v405_v7, 0  ;;  %v416_v16 = vsel %vm411_vm0, %v406_v15, 0  ;;  %843 = vperm.xlu2 %1042, %v840_v6   ;;  %p1098_p4 = por %p1097_p3, %p1096_p1 }
  0x37   : > { %425 = vmatpush.bf16.msra.mxu0 %v413_v11  ;;  %534 = vmatpush.msrb.mxu2 %v1143_v12  ;;  %p1094_p0 = pneg %p1093_p13 }
  0x38   : > { %554 = vmatpush.msrb.mxu3 %v1143_v12  ;;  %438 = vmatpush.bf16.msra.mxu1 %v416_v16 }
  0x39   : > { %535 = vmatpush.msrb.mxu2 %v1143_v12  ;;  %p1099_p7 = pnand %p1098_p4, %p1094_p0 }
  0x3a   : > { %964 = vmatmul.msk.bf16.vlgmr.msra.gmra.mxu0 %vm407_vm1, %v1315_v13  ;;  %555 = vmatpush.msrb.mxu3 %v1143_v12 }
  0x3b   : > { %536 = vmatpush.msrb.mxu2 %v1143_v12  ;;  %965 = vmatmul.msk.bf16.vlgmr.msra.gmra.mxu1 %vm407_vm1, %v1315_v13 }
  0x3c   : > { %556 = vmatpush.msrb.mxu3 %v1143_v12 }
  0x3d   : > { %537 = vmatpush.msrb.mxu2 %v1143_v12 }
  0x3e   : > { %557 = vmatpush.msrb.mxu3 %v1143_v12 }
  0x3f   : > { %538 = vmatpush.msrb.mxu2 %v1143_v12 }
  0x40   : > { %558 = vmatpush.msrb.mxu3 %v1143_v12 }
  0x41   : > { %539 = vmatpush.msrb.mxu2 %v1143_v12 }
  0x42   : > { %559 = vmatpush.msrb.mxu3 %v1143_v12 }
  0x43   : > { %540 = vmatpush.msrb.mxu2 %v1143_v12 }
  0x44   : > { %560 = vmatpush.msrb.mxu3 %v1143_v12 }
  0x45   : > { %541 = vmatpush.msrb.mxu2 %v1143_v12 }
  0x46   : > { %561 = vmatpush.msrb.mxu3 %v1143_v12 }
  0x47   : > { %542 = vmatpush.msrb.mxu2 %v1143_v12 }
  0x48   : > { %562 = vmatpush.msrb.mxu3 %v1143_v12 }
  0x49   : > { %543 = vmatpush.msrb.mxu2 %v1143_v12 }
  0x4a   : > { %563 = vmatpush.msrb.mxu3 %v1143_v12 }
  0x4b   : > { %544 = vmatpush.msrb.mxu2 %v1143_v12 }
  0x4c   : > { %564 = vmatpush.msrb.mxu3 %v1143_v12 }
  0x4d   : > { %545 = vmatpush.msrb.mxu2 %v1143_v12 }
  0x4e   : > { %565 = vmatpush.msrb.mxu3 %v1143_v12 }
  0x4f   : > { %546 = vmatpush.msrb.mxu2 %v1143_v12 }
  0x50   : > { %566 = vmatpush.msrb.mxu3 %v1143_v12 }
  0x51   : > { %547 = vmatpush.msrb.mxu2 %v1143_v12 }
  0x52   : > { %567 = vmatpush.msrb.mxu3 %v1143_v12 }
  0x53   : > { %548 = vmatpush.msrb.mxu2 %v1143_v12 }
  0x54   : > { %568 = vmatpush.msrb.mxu3 %v1143_v12 }
  0x55   : > { %675 = vmatpush.msra.mxu2 %v1143_v12 }
  0x56   : > { %695 = vmatpush.msra.mxu3 %v1143_v12 }
  0x57   : > { %676 = vmatpush.msra.mxu2 %v1143_v12 }
  0x58   : > { %696 = vmatpush.msra.mxu3 %v1143_v12 }
  0x59   : > { %677 = vmatpush.msra.mxu2 %v1143_v12 }
  0x5a   : > { %697 = vmatpush.msra.mxu3 %v1143_v12 }
  0x5b   : > { %678 = vmatpush.msra.mxu2 %v1143_v12 }
  0x5c   : > { %698 = vmatpush.msra.mxu3 %v1143_v12 }
  0x5d   : > { %679 = vmatpush.msra.mxu2 %v1143_v12 }
  0x5e   : > { %699 = vmatpush.msra.mxu3 %v1143_v12 }
  0x5f   : > { %680 = vmatpush.msra.mxu2 %v1143_v12 }
  0x60   : > { %700 = vmatpush.msra.mxu3 %v1143_v12 }
  0x61   : > { %681 = vmatpush.msra.mxu2 %v1143_v12 }
  0x62   : > { %701 = vmatpush.msra.mxu3 %v1143_v12 }
  0x63   : > { %682 = vmatpush.msra.mxu2 %v1143_v12 }
  0x64   : > { %702 = vmatpush.msra.mxu3 %v1143_v12 }
  0x65   : > { %683 = vmatpush.msra.mxu2 %v1143_v12 }
  0x66   : > { %703 = vmatpush.msra.mxu3 %v1143_v12 }
  0x67   : > { %684 = vmatpush.msra.mxu2 %v1143_v12 }
  0x68   : > { %704 = vmatpush.msra.mxu3 %v1143_v12 }
  0x69   : > { %685 = vmatpush.msra.mxu2 %v1143_v12 }
  0x6a   : > { %705 = vmatpush.msra.mxu3 %v1143_v12 }
  0x6b   : > { %686 = vmatpush.msra.mxu2 %v1143_v12 }
  0x6c   : > { %706 = vmatpush.msra.mxu3 %v1143_v12 }
  0x6d   : > { %687 = vmatpush.msra.mxu2 %v1143_v12 }
  0x6e   : > { %707 = vmatpush.msra.mxu3 %v1143_v12 }
  0x6f   : > { %688 = vmatpush.msra.mxu2 %v1143_v12 }
  0x70   : > { %708 = vmatpush.msra.mxu3 %v1143_v12 }
  0x71   : > { %689 = vmatpush.msra.mxu2 %v1143_v12 }
  0x72   : > { %709 = vmatpush.msra.mxu3 %v1143_v12 }
  0x73   : > { %690 = vmatpush.msra.mxu2 %v1143_v12 }
  0x74   : > { %710 = vmatpush.msra.mxu3 %v1143_v12 }
  0x90   : > { %v844_v16 = vpop.permute.xlu2 %843 }
  0xb7   : > { %v427_v17 = vpop.f32.mrf.mxu0  ;;  %v474_v20 = vpop.f32.mrf.mxu2 }
  0xb8   : > { %v494_v18 = vpack.c.bf16 %v427_v17, %v427_v17  ;;  %v488_v21 = vpop.f32.mrf.mxu3  ;;  %v440_v28 = vpop.f32.mrf.mxu1 }
  0xb9   : > { %v495_v29 = vpack.c.bf16 %v440_v28, %v440_v28 }
  0xba   : > { %v500_v19 = vsel %vm411_vm0, %v494_v18, 0 }
  0xbb   : > { %512 = vmatpush.bf16.msrb.mxu0 %v500_v19  ;;  %v503_v30 = vsel %vm411_vm0, %v495_v29, 0  ;;  %v848_v19 = vunpack.c.l.bf16 %v1301_v1 }
  0xbc   : > { %525 = vmatpush.bf16.msrb.mxu1 %v503_v30 }
  0xbe   : > { %972 = vmatmul.msk.bf16.vlgmr.msrb.gmra.mxu0 %vm407_vm1, %v493_v22 }
  0xbf   : > { %v429_v23 = vpop.f32.mrf.mxu0  ;;  %v476_v24 = vpop.f32.mrf.mxu2  ;;  %973 = vmatmul.msk.bf16.vlgmr.msrb.gmra.mxu1 %vm407_vm1, %v493_v22 }
  0xc0   : > { %v490_v25 = vpop.f32.mrf.mxu3  ;;  %v531_v26 = vmul.f32 %v476_v24, %v474_v20  ;;  %v442_v31 = vpop.f32.mrf.mxu1  ;;  %v849_v20 = vunpack.c.h.bf16 %v1301_v1 }
  0xc1   : > { %v532_v27 = vmul.f32 %v490_v25, %v488_v21 }
  0xc2   : > { %549 = vmatmul.f32.vlgmr.msrb.gmra.mxu2 %v531_v26 }
  0xc3   : > { %569 = vmatmul.f32.vlgmr.msrb.gmra.mxu3 %v532_v27 }
 0x13b   : > { %v514_v32 = vpop.f32.mrf.mxu0 }
 0x13c   : > { %v527_v39 = vpop.f32.mrf.mxu1 }
 0x143   : > { %v516_v33 = vpop.f32.mrf.mxu0 }
 0x144   : > { %v529_v40 = vpop.f32.mrf.mxu1 }
 0x145   : > { %v550_v34 = vpop.f32.mrf.mxu2 }
 0x146   : > { %v570_v35 = vpop.f32.mrf.mxu3 }
 0x147   : > { %v571_v36 = vadd.f32 %v570_v35, %v550_v34 }
 0x149   : > { %592 = vmatpush.msra.mxu0 %v571_v36 }
 0x14a   : > { %974 = vmatmul.msk.f32.vlgmr.msra.gmra.mxu0 %vm407_vm1, %v573_v37 }
 0x14b   : > { %633 = vmatpush.msrb.mxu0 %v1143_v12 }
 0x14d   : > { %634 = vmatpush.msrb.mxu0 %v1143_v12 }
 0x14f   : > { %635 = vmatpush.msrb.mxu0 %v1143_v12 }
 0x151   : > { %636 = vmatpush.msrb.mxu0 %v1143_v12 }
 0x153   : > { %637 = vmatpush.msrb.mxu0 %v1143_v12 }
 0x155   : > { %638 = vmatpush.msrb.mxu0 %v1143_v12 }
 0x157   : > { %639 = vmatpush.msrb.mxu0 %v1143_v12 }
 0x159   : > { %640 = vmatpush.msrb.mxu0 %v1143_v12 }
 0x15b   : > { %641 = vmatpush.msrb.mxu0 %v1143_v12 }
 0x15d   : > { %642 = vmatpush.msrb.mxu0 %v1143_v12 }
 0x15f   : > { %643 = vmatpush.msrb.mxu0 %v1143_v12 }
 0x161   : > { %644 = vmatpush.msrb.mxu0 %v1143_v12 }
 0x163   : > { %645 = vmatpush.msrb.mxu0 %v1143_v12 }
 0x165   : > { %646 = vmatpush.msrb.mxu0 %v1143_v12 }
 0x167   : > { %647 = vmatpush.msrb.mxu0 %v1143_v12 }
 0x169   : > { %648 = vmatpush.msrb.mxu0 %v1143_v12 }
 0x1c7   : > { %v594_v42 = vpop.f32.mrf.mxu0 }
 0x1c8   : > { %975 = vmatpush.msk.msra.mxu1 %vm602_vm2, %v594_v42 }
 0x1c9   : > { %976 = vmatmul.msk.f32.vlgmr.msra.gmra.mxu1 %vm598_vm3, %v597_v41 }
 0x1ca   : > { %653 = vmatpush.msrb.mxu1 %v1143_v12 }
 0x1cc   : > { %654 = vmatpush.msrb.mxu1 %v1143_v12 }
 0x1ce   : > { %655 = vmatpush.msrb.mxu1 %v1143_v12 }
 0x1d0   : > { %656 = vmatpush.msrb.mxu1 %v1143_v12 }
 0x1d2   : > { %657 = vmatpush.msrb.mxu1 %v1143_v12 }
 0x1d4   : > { %658 = vmatpush.msrb.mxu1 %v1143_v12 }
 0x1d6   : > { %659 = vmatpush.msrb.mxu1 %v1143_v12 }
 0x1d8   : > { %660 = vmatpush.msrb.mxu1 %v1143_v12 }
 0x1da   : > { %661 = vmatpush.msrb.mxu1 %v1143_v12 }
 0x1dc   : > { %662 = vmatpush.msrb.mxu1 %v1143_v12 }
 0x1de   : > { %663 = vmatpush.msrb.mxu1 %v1143_v12 }
 0x1e0   : > { %664 = vmatpush.msrb.mxu1 %v1143_v12 }
 0x1e2   : > { %665 = vmatpush.msrb.mxu1 %v1143_v12 }
 0x1e4   : > { %666 = vmatpush.msrb.mxu1 %v1143_v12 }
 0x1e6   : > { %667 = vmatpush.msrb.mxu1 %v1143_v12 }
 0x1e8   : > { %668 = vmatpush.msrb.mxu1 %v1143_v12 }
 0x246   : > { %v623_v43 = vpop.f32.mrf.mxu1 }
 0x247   : > { %628 = vperm.xlu0 %1040, %v623_v43  }
 0x2b9   : > { %v629_v44 = vpop.permute.xlu0 %628 }
 0x2ba   : > { %v631_v45 = vmul.f32 %v629_v44, %v514_v32  ;;  %v632_v46 = vmul.f32 %v629_v44, %v527_v39 }
 0x2bc   : > { %v673_v47 = vmul.f32 %v631_v45, %v631_v45  ;;  %v674_v48 = vmul.f32 %v632_v46, %v632_v46  ;;  %649 = vmatmul.f32.vlgmr.msrb.gmra.mxu0 %v631_v45  ;;  %669 = vmatmul.f32.vlgmr.msrb.gmra.mxu1 %v632_v46 }
 0x2be   : > { %691 = vmatmul.f32.vlgmr.msra.gmra.mxu2 %v673_v47  ;;  %711 = vmatmul.f32.vlgmr.msra.gmra.mxu3 %v674_v48 }
 0x339   : > { %v650_v49 = vpop.f32.mrf.mxu0  ;;  %v670_v50 = vpop.f32.mrf.mxu1 }
 0x33a   : > { %v671_v51 = vadd.f32 %v670_v50, %v650_v49 }
 0x33c   : > { %734 = vmatpush.msra.mxu0 %v671_v51 }
 0x33d   : > { %977 = vmatmul.msk.f32.vlgmr.msra.gmra.mxu0 %vm407_vm1, %v715_v52 }
 0x341   : > { %v692_v53 = vpop.f32.mrf.mxu2  ;;  %v712_v54 = vpop.f32.mrf.mxu3 }
 0x342   : > { %v713_v55 = vadd.f32 %v712_v54, %v692_v53 }
 0x344   : > { %754 = vmatpush.msra.mxu1 %v713_v55 }
 0x345   : > { %978 = vmatmul.msk.f32.vlgmr.msra.gmra.mxu1 %vm407_vm1, %v715_v52 }
 0x3ba   : > { %v736_v56 = vpop.f32.mrf.mxu0 }
 0x3bb   : > { %979 = vmatpush.msk.msrb.mxu2 %vm602_vm2, %v736_v56  ;;  %v759_v57 = vmul.f32 %v736_v56, %v736_v56 }
 0x3bc   : > { %980 = vmatmul.msk.f32.vlgmr.msrb.gmra.mxu2 %vm598_vm3, %v597_v41 }
 0x3c2   : > { %v756_v58 = vpop.f32.mrf.mxu1 }
 0x3c3   : > { %v760_v59 = vsub.f32 %v756_v58, %v759_v57 }
 0x3c5   : > { %v761_v60 = vadd.f32 1e-05, %v760_v59 }
 0x3c7   : > { %1043 = vrsqrt.f32 %v761_v60  ;;  %vm768_vm5 = vweird.f32 %v761_v60 }
 0x3cd   : > { %v1044_v61 = vpop.eup %1043 }
 0x3ce   : > { %v763_v62 = vmul.f32 %v1044_v61, %v761_v60  ;;  %vm769_vm4 = vweird.f32 %v1044_v61 }
 0x3cf   : > { %vm770_vm6 = vmor %vm768_vm5, %vm769_vm4 }
 0x3d0   : > { %v764_v63 = vmul.f32 %v1044_v61, %v763_v62 }
 0x3d2   : > { %v765_v0 = vmul.f32 0.5, %v764_v63 }
 0x3d4   : > { %v766_v2 = vsub.f32 1.5, %v765_v0 }
 0x3d6   : > { %v767_v3 = vmul.f32 %v1044_v61, %v766_v2 }
 0x3d8   : > { %v771_v4 = vsel %vm770_vm6, %v1044_v61, %v767_v3 }
 0x3d9   : > { %981 = vmatpush.msk.msrb.mxu3 %vm602_vm2, %v771_v4 }
 0x3da   : > { %982 = vmatmul.msk.f32.vlgmr.msrb.gmra.mxu3 %vm598_vm3, %v597_v41 }
 0x43f   : > { %v792_v5 = vpop.f32.mrf.mxu2 }
 0x440   : > { %820 = vperm.xlu0 %1040, %v792_v5  }
 0x45d   : > { %v815_v7 = vpop.f32.mrf.mxu3 }
 0x45e   : > { %827 = vperm.xlu1 %1041, %v815_v7  }
 0x466   : > { %835 = vperm.xlu1 %1041, %v832_v8  }
 0x4b2   : > { %v821_v10 = vpop.permute.xlu0 %820 }
 0x4b3   : > { %v823_v11 = vsub.f32 %v631_v45, %v821_v10  ;;  %v824_v12 = vsub.f32 %v632_v46, %v821_v10 }
 0x4d0   : > { %v828_v9 = vpop.permute.xlu1 %827 }
 0x4d1   : > { %v830_v13 = vmul.f32 %v828_v9, %v823_v11  ;;  %v831_v14 = vmul.f32 %v828_v9, %v824_v12 }
 0x4d8   : > { %v836_v15 = vpop.permute.xlu1 %835 }
 0x4d9   : > { %v838_v17 = vmul.f32 %v836_v15, %v830_v13  ;;  %v839_v18 = vmul.f32 %v836_v15, %v831_v14 }
 0x4db   : > { %v846_v21 = vadd.f32 %v844_v16, %v838_v17  ;;  %v847_v22 = vadd.f32 %v844_v16, %v839_v18 }
 0x4dd   : > { %v850_v23 = vadd.f32 %v848_v19, %v846_v21  ;;  %v851_v24 = vadd.f32 %v849_v20, %v847_v22 }
 0x4df   : > { %v852_v25 = vpack.c.bf16 %v851_v24, %v850_v23 }
 0x4e1   : > { %853 = vst [vmem:[%s392_s17] sm:$0xff] %v852_v25 }
 0x4e2   : > { %1102 = shalt.err (!%p1099_p7)
}
 0x4e3   : > { %994 = dma.vmem_to_hbm [thread:$0]  (%p1250_p11), %s869_s12, 128, %s871_s15, %s855_s22  }
 0x4e4 PF: > { %s882_s23 = sand.u32 1, %s1129_s13   ;;  %p1512_p5 = scmp.ge.s32.totalorder %s1141_s16, 2 }
 0x4e5   : > { %s883_s30 = scalar_lea.sflag [#allocation4], %s882_s23 }
 0x4e6   : > { %p1001_p8 = pnand %p1512_p5, %p1254_p12 }
 0x4e8   : > { %p1002_p10 = pneg %p1001_p8 }
 0x4ea   : > { %1124 = dma.done.wait (%p1002_p10), %s883_s30, 128  }
 0x4eb   : > { %1126 = vsyncadd (%p1002_p10), %s883_s30, 4294967168  ;;  %s1513_s16 = sld [smem:[#allocation9_spill]]  ;;  %s1516_s13 = smov %s1133_s14 }
 0x4ec   : > { %s1514_s11 = sld [smem:[#allocation8_spill]] }
 0x4ed   : > { %s1515_s15 = sld [smem:[#allocation10_spill]] }
 0x4f1   : > { %p23_p2 = scmp.ge.s32.totalorder %s1513_s16, 4  }
 0x4f2   : > { %s1517_s14 = smov %s1514_s11 }
 0x4f3   :  { %25 = sbr.rel (!%p23_p2) target bundleno = 5 (0x5), region = 108 }
 0x4f8   :  { %889 = vsyncpa [#allocation3], 1 }
 0x4f9   :  { %891 = vsyncpa [#allocation3 + $0x1], 1 }
 0x4fa   :  { %892 = vsyncpa [#allocation4], 1 }
 0x4fb   :  { %894 = vsyncpa [#allocation4 + $0x1], 1 }

</bundles_post_ra>
